<compile_context>
chip_gen: v7x
topology: tpu7x:2x2x1
jax: 0.10.0
libtpu: 0.0.40
codegen_flags: <defaults>
</compile_context>

<pallas_src>
import functools

import jax
import jax.numpy as jnp
import numpy as np
from jax.experimental import pallas as pl
from jax.experimental.pallas import tpu as pltpu


# --------------------------------------------------------------------------- #
# Host-side weight preparation (one-time layout transform; nothing structural
# is rebuilt inside the kernel)
# --------------------------------------------------------------------------- #
def _fold_conv_weight(wt_oihw, w_spatial):
    """PyTorch (Cout, Cin, 3, 3) -> (3, W*Cin, W*Cout) row-grouped block matrices.

    m[kh, w_in*Cin + ci, w_out*Cout + co] = wt[co, ci, kh, kw],  kw = w_in - w_out + 1
    (zero outside [0, 3)), so a 'same'-padded 3x3 conv on the lane-folded (W*C)
    layout is  out[h] = sum_kh  x[h + kh - 1] @ m[kh], with horizontal zero padding
    baked into the zero blocks.
    """
    wt = np.asarray(wt_oihw, np.float32)
    cout, cin = wt.shape[0], wt.shape[1]
    m = np.zeros((3, w_spatial * cin, w_spatial * cout), np.float32)
    for kh in range(3):
        for w_out in range(w_spatial):
            for kw in range(3):
                w_in = w_out + kw - 1
                if 0 <= w_in < w_spatial:
                    m[kh,
                      w_in * cin:(w_in + 1) * cin,
                      w_out * cout:(w_out + 1) * cout] = wt[:, :, kh, kw].T
    return m


def _stack_kh(m3):
    """(3, K, Kout) -> (3K, Kout): one K=3*W*C matmul per conv (order: up|center|down)."""
    return np.concatenate([m3[0], m3[1], m3[2]], axis=0)


def prepare_params(raw, H, W):
    """Fold PyTorch-layout parameters into the lane-folded, kh-stacked matmul form."""
    C = int(np.asarray(raw["c5_w"]).shape[1])
    Wp, WpC, WC = W // 2, (W // 2) * C, W * C
    assert W & (W - 1) == 0, "kernel's BN lane all-reduce assumes W is a power of two"

    # phase1_3 input is (x + out3) == 2*x with the identity backbone stub; the factor
    # 2 is folded into the bias-free conv weights.
    # TODO(synk): rebuild m13 without the 2x fold if a real Backbone is plugged in.
    m13 = _stack_kh(_fold_conv_weight(2.0 * np.asarray(raw["p13_w"], np.float32), W))
    m4 = _stack_kh(_fold_conv_weight(raw["c4_w"], W))

    # conv5: fold on the pooled Wp grid, then re-expand so it reads directly from the
    # UNCOMPACTED pooled lanes (valid data at even W-groups) and writes the compacted
    # result into output lanes [0:WpC] (rest stays 0 -> full 128-lane store).
    f5 = _fold_conv_weight(raw["c5_w"], Wp)                      # (3, WpC, WpC)
    k = np.arange(WpC)
    expand_idx = 2 * (k // C) * C + (k % C)                      # compact lane -> even-group lane
    m5e = np.zeros((3, WC, WC), np.float32)
    m5e[:, expand_idx, :WpC] = f5
    m5 = _stack_kh(m5e)

    b5 = np.zeros((WC,), np.float32)
    b5[:WpC] = np.tile(np.asarray(raw["c5_b"], np.float32), Wp)

    return {
        # bf16 MXU operands (halves the dominant weight DMA); f32 elementwise params.
        "m13": jnp.asarray(m13, jnp.bfloat16),
        "m4": jnp.asarray(m4, jnp.bfloat16),
        "m5": jnp.asarray(m5, jnp.bfloat16),
        "gamma_f": jnp.asarray(np.tile(np.asarray(raw["p13_gamma"], np.float32), W)[None, :]),
        "beta_f": jnp.asarray(np.tile(np.asarray(raw["p13_beta"], np.float32), W)[None, :]),
        "b4_f": jnp.asarray(np.tile(np.asarray(raw["c4_b"], np.float32), W)[None, :]),
        "b5_f": jnp.asarray(b5[None, :]),
    }


# --------------------------------------------------------------------------- #
# Single fused kernel: phase1_3 -> (+x) -> conv4 -> maxpool -> conv5
# --------------------------------------------------------------------------- #
def _fused_forward_kernel(x_ref, m13_ref, m4_ref, m5_ref,
                          gamma_ref, beta_ref, b4_ref, b5_ref, o_ref,
                          *, N, H, W, C, eps):
    f32, bf16 = jnp.float32, jnp.bfloat16
    NH, WC = N * H, W * C

    def _roll(v, shift, axis):
        return pltpu.roll(v, shift % v.shape[axis], axis)       # non-negative static shift

    # Per-image row masks (one small iota; all large structural constants are folded
    # into the prepped weights, nothing else is rebuilt per call).
    h_img = jax.lax.broadcasted_iota(jnp.int32, (NH, WC), 0) % H
    top1, bot1 = h_img == 0, h_img == H - 1          # full-res image boundaries
    top2, bot2 = h_img < 2, h_img >= H - 2           # pooled (row-sparse) boundaries

    def conv3x3(a, m_ref, bias_row, top_m, bot_m, step):
        # ONE K=3*WC MXU matmul: rows shifted with pltpu.roll (XLU) and zeroed at the
        # image boundary, concatenated along lanes against the kh-stacked folded weight.
        a_up = jnp.where(top_m, 0.0, _roll(a, step, 0))          # a[h - step]
        a_dn = jnp.where(bot_m, 0.0, _roll(a, -step, 0))         # a[h + step]
        a3 = jnp.concatenate([a_up, a, a_dn], axis=-1).astype(bf16)
        out = jnp.dot(a3, m_ref[...], preferred_element_type=f32)
        if bias_row is not None:
            out = out + bias_row
        return out

    x = x_ref[...]                                    # (NH, WC) lane-folded NHWC, f32

    # ---- phase1_3: conv3x3 (bias-free, 2x residual folded in) -> LeakyReLU -> BN ----
    y = conv3x3(x, m13_ref, None, top1, bot1, 1)
    y = jnp.where(y > 0, y, 0.1 * y)                  # LeakyReLU(0.1)

    # Training-mode BatchNorm (batch stats, biased variance), one pass E[y^2]-mean^2:
    # sublane-reduce over rows, then a log2(W) roll add-tree over the W lane groups ->
    # per-channel sums replicated on every lane. No matmuls, no (WC,WC) constants.
    s1 = jnp.sum(y, axis=0, keepdims=True)            # (1, WC)
    s2 = jnp.sum(y * y, axis=0, keepdims=True)

    def lane_channel_allreduce(v):
        shift = C
        while shift < WC:
            v = v + _roll(v, -shift, 1)
            shift *= 2
        return v

    inv_cnt = 1.0 / float(N * H * W)
    mean_b = lane_channel_allreduce(s1) * inv_cnt
    msq_b = lane_channel_allreduce(s2) * inv_cnt
    var_b = msq_b - mean_b * mean_b
    out3 = (y - mean_b) * (gamma_ref[...] * jax.lax.rsqrt(var_b + eps)) + beta_ref[...]

    # ---- conv4 on (out3 + out4); out4 == x with the identity backbone stub ----
    h4 = conv3x3(out3 + x, m4_ref, b4_ref[...], top1, bot1, 1)

    # ---- maxpool3 (2x2, stride 2), kept row/lane SPARSE: valid values live at even
    #      rows / even W-groups; no selection matmuls, no strided reads. ----
    rmax = jnp.maximum(h4, _roll(h4, -1, 0))          # rows:  max(h, h+1)
    cmax = jnp.maximum(rmax, _roll(rmax, -C, 1))      # lanes: max(w, w+1)

    # ---- conv5 directly on the sparse pooled layout: vertical taps are +/-2 rows,
    #      the lane compaction is folded into m5; output lanes [0:Wp*C] hold the
    #      result (rest 0) -> full-width (NH, WC) unmasked store. ----
    o_ref[...] = conv3x3(cmax, m5_ref, b5_ref[...], top2, bot2, 2)


# --------------------------------------------------------------------------- #
# Wrapper: NCHW <-> lane-folded layout + single pallas_call
# --------------------------------------------------------------------------- #
@jax.jit
def architecture_forward(x_nchw, prepped):
    N, C, H, W = x_nchw.shape
    Hp, Wp = H // 2, W // 2
    x_f = jnp.transpose(x_nchw.astype(jnp.float32), (0, 2, 3, 1)).reshape(N * H, W * C)

    kernel = functools.partial(_fused_forward_kernel, N=N, H=H, W=W, C=C, eps=1e-5)
    vmem = pl.BlockSpec(memory_space=pltpu.MemorySpace.VMEM)
    out_f = pl.pallas_call(
        kernel,
        out_shape=jax.ShapeDtypeStruct((N * H, W * C), jnp.float32),
        in_specs=[vmem] * 8,
        out_specs=vmem,
    )(x_f, prepped["m13"], prepped["m4"], prepped["m5"],
      prepped["gamma_f"], prepped["beta_f"], prepped["b4_f"], prepped["b5_f"])

    # Strip the sparse pooled layout (valid at even rows / first Wp*C lanes) -> NCHW.
    out = out_f.reshape(N, H, W * C)[:, ::2, :Wp * C].reshape(N, Hp, Wp, C)
    return jnp.transpose(out, (0, 3, 1, 2))


# --------------------------------------------------------------------------- #
# Pure-JAX reference (all-f32, for correctness check)
# --------------------------------------------------------------------------- #
def ref_forward(x_nchw, raw):
    x = jnp.transpose(x_nchw, (0, 2, 3, 1)).astype(jnp.float32)
    C = x.shape[-1]

    def conv(inp, w_oihw, b):
        w = jnp.transpose(jnp.asarray(w_oihw, jnp.float32), (2, 3, 1, 0))  # OIHW->HWIO
        y = jax.lax.conv_general_dilated(
            inp, w, window_strides=(1, 1), padding="SAME",
            dimension_numbers=("NHWC", "HWIO", "NHWC"))
        return y + jnp.asarray(b, jnp.float32).reshape(1, 1, 1, -1)

    out4 = x
    out3 = x
    y = conv(x + out3, raw["p13_w"], jnp.zeros((C,), jnp.float32))
    y = jnp.where(y > 0, y, 0.1 * y)
    mean = y.mean(axis=(0, 1, 2))
    var = y.var(axis=(0, 1, 2))
    out3 = (y - mean) * raw["p13_gamma"] / jnp.sqrt(var + 1e-5) + raw["p13_beta"]
    out = conv(out3 + out4, raw["c4_w"], raw["c4_b"])
    n, h, w, c = out.shape
    out = out.reshape(n, h // 2, 2, w // 2, 2, c).max(axis=(2, 4))
    out = conv(out, raw["c5_w"], raw["c5_b"])
    return jnp.transpose(out, (0, 3, 1, 2))


# --------------------------------------------------------------------------- #
if __name__ == "__main__":
    key = jax.random.PRNGKey(0)
    N, C, H, W = 2, 8, 16, 16   # Cin == Cout required by the residual adds; W*C = 128 lanes
    ks = jax.random.split(key, 8)

    x = jax.random.normal(ks[0], (N, C, H, W), dtype=jnp.float32)

    raw = {
        # phase1_3: conv (no bias) + BatchNorm affine
        "p13_w": jax.random.normal(ks[1], (C, C, 3, 3), jnp.float32) * 0.1,
        "p13_gamma": 1.0 + 0.2 * jax.random.normal(ks[6], (C,), jnp.float32),
        "p13_beta": 0.2 * jax.random.normal(ks[7], (C,), jnp.float32),
        # conv4 / conv5 (with bias)
        "c4_w": jax.random.normal(ks[2], (C, C, 3, 3), jnp.float32) * 0.1,
        "c4_b": jax.random.normal(ks[3], (C,), jnp.float32) * 0.1,
        "c5_w": jax.random.normal(ks[4], (C, C, 3, 3), jnp.float32) * 0.1,
        "c5_b": jax.random.normal(ks[5], (C,), jnp.float32) * 0.1,
    }

    prepped = prepare_params(raw, H, W)

    out = jax.block_until_ready(architecture_forward(x, prepped))
    ref = jax.block_until_ready(ref_forward(x, raw))

    assert out.shape == (N, C, H // 2, W // 2), out.shape
    # bf16 MXU operands vs an all-f32 reference -> tolerance loosened accordingly.
    np.testing.assert_allclose(np.asarray(out), np.asarray(ref), rtol=5e-2, atol=5e-2)

    print("KERNEL_OK")
</pallas_src>

<mosaic_0001>
module attributes {stable_mosaic.version = 11 : i64} {
  func.func @_fused_forward_kernel(%arg0: memref<32x128xf32, #tpu.memory_space<vmem>>, %arg1: memref<384x128xbf16, #tpu.memory_space<vmem>>, %arg2: memref<384x128xbf16, #tpu.memory_space<vmem>>, %arg3: memref<384x128xbf16, #tpu.memory_space<vmem>>, %arg4: memref<1x128xf32, #tpu.memory_space<vmem>>, %arg5: memref<1x128xf32, #tpu.memory_space<vmem>>, %arg6: memref<1x128xf32, #tpu.memory_space<vmem>>, %arg7: memref<1x128xf32, #tpu.memory_space<vmem>>, %arg8: memref<32x128xf32, #tpu.memory_space<vmem>>) attributes {dimension_semantics = [], scalar_prefetch = 0 : i64, scratch_operands = 0 : i64, tpu.core_type = #tpu.core_type<tc>} {
    %0 = tpu.iota {dimensions = array<i32: 0>} : vector<32x128xi32>
    %c16_i32 = arith.constant 16 : i32
    %c0_i32 = arith.constant 0 : i32
    %1 = arith.cmpi eq, %c16_i32, %c0_i32 : i32
    %c1_i32 = arith.constant 1 : i32
    %2 = arith.select %1, %c1_i32, %c16_i32 : i32
    %3 = vector.broadcast %2 : i32 to vector<32x128xi32>
    %4 = arith.remsi %0, %3 : vector<32x128xi32>
    %c0_i32_0 = arith.constant 0 : i32
    %5 = vector.broadcast %c0_i32_0 : i32 to vector<32x128xi32>
    %6 = arith.cmpi ne, %4, %5 : vector<32x128xi32>
    %c0_i32_1 = arith.constant 0 : i32
    %7 = vector.broadcast %c0_i32_1 : i32 to vector<32x128xi32>
    %8 = arith.cmpi slt, %4, %7 : vector<32x128xi32>
    %c0_i32_2 = arith.constant 0 : i32
    %9 = arith.cmpi slt, %2, %c0_i32_2 : i32
    %10 = vector.broadcast %9 : i1 to vector<32x128xi1>
    %11 = vector.broadcast %10 : vector<32x128xi1> to vector<32x128xi1>
    %12 = arith.xori %8, %11 : vector<32x128xi1>
    %13 = arith.andi %12, %6 : vector<32x128xi1>
    %14 = vector.broadcast %2 : i32 to vector<32x128xi32>
    %15 = arith.addi %4, %14 : vector<32x128xi32>
    %16 = arith.select %13, %15, %4 : vector<32x128xi1>, vector<32x128xi32>
    %c0_i32_3 = arith.constant 0 : i32
    %17 = vector.broadcast %c0_i32_3 : i32 to vector<32x128xi32>
    %18 = arith.cmpi eq, %16, %17 : vector<32x128xi32>
    %c15_i32 = arith.constant 15 : i32
    %19 = vector.broadcast %c15_i32 : i32 to vector<32x128xi32>
    %20 = arith.cmpi eq, %16, %19 : vector<32x128xi32>
    %c2_i32 = arith.constant 2 : i32
    %21 = vector.broadcast %c2_i32 : i32 to vector<32x128xi32>
    %22 = arith.cmpi slt, %16, %21 : vector<32x128xi32>
    %c14_i32 = arith.constant 14 : i32
    %23 = vector.broadcast %c14_i32 : i32 to vector<32x128xi32>
    %24 = arith.cmpi sge, %16, %23 : vector<32x128xi32>
    %c0 = arith.constant 0 : index
    %c0_4 = arith.constant 0 : index
    %25 = vector.load %arg0[%c0, %c0_4] : memref<32x128xf32, #tpu.memory_space<vmem>>, vector<32x128xf32>
    %c1_i32_5 = arith.constant 1 : i32
    %26 = tpu.dynamic_rotate %25 by %c1_i32_5 dim 0 : vector<32x128xf32>, i32 -> vector<32x128xf32>
    %cst = arith.constant 0.000000e+00 : f32
    %27 = vector.broadcast %cst : f32 to vector<32x128xf32>
    %28 = arith.select %18, %27, %26 : vector<32x128xi1>, vector<32x128xf32>
    %c31_i32 = arith.constant 31 : i32
    %29 = tpu.dynamic_rotate %25 by %c31_i32 dim 0 : vector<32x128xf32>, i32 -> vector<32x128xf32>
    %cst_6 = arith.constant 0.000000e+00 : f32
    %30 = vector.broadcast %cst_6 : f32 to vector<32x128xf32>
    %31 = arith.select %20, %30, %29 : vector<32x128xi1>, vector<32x128xf32>
    %32 = tpu.concatenate %28, %25, %31 in 1 : vector<32x128xf32>, vector<32x128xf32>, vector<32x128xf32> -> vector<32x384xf32>
    %33 = arith.truncf %32 : vector<32x384xf32> to vector<32x384xbf16>
    %c0_7 = arith.constant 0 : index
    %c0_8 = arith.constant 0 : index
    %34 = vector.load %arg1[%c0_7, %c0_8] : memref<384x128xbf16, #tpu.memory_space<vmem>>, vector<384x128xbf16>
    %cst_9 = arith.constant dense<0.000000e+00> : vector<32x128xf32>
    %35 = tpu.matmul %33, %34, %cst_9 {dimension_numbers = #tpu.dot_dimension_numbers<[1], [0], [0], [1], [0, 0, 1, 1], [], []>} : vector<32x384xbf16>, vector<384x128xbf16>, vector<32x128xf32> -> vector<32x128xf32>
    %cst_10 = arith.constant 0.000000e+00 : f32
    %36 = vector.broadcast %cst_10 : f32 to vector<32x128xf32>
    %37 = arith.cmpf ogt, %35, %36 : vector<32x128xf32>
    %cst_11 = arith.constant 1.000000e-01 : f32
    %38 = vector.broadcast %cst_11 : f32 to vector<32x128xf32>
    %39 = arith.mulf %38, %35 : vector<32x128xf32>
    %40 = arith.select %37, %35, %39 : vector<32x128xi1>, vector<32x128xf32>
    %cst_12 = arith.constant dense<0.000000e+00> : vector<128xf32>
    %41 = vector.multi_reduction <add>, %40, %cst_12 [0] : vector<32x128xf32> to vector<128xf32>
    %42 = vector.shape_cast %41 : vector<128xf32> to vector<1x128xf32>
    %43 = arith.mulf %40, %40 : vector<32x128xf32>
    %cst_13 = arith.constant dense<0.000000e+00> : vector<128xf32>
    %44 = vector.multi_reduction <add>, %43, %cst_13 [0] : vector<32x128xf32> to vector<128xf32>
    %45 = vector.shape_cast %44 : vector<128xf32> to vector<1x128xf32>
    %c120_i32 = arith.constant 120 : i32
    %46 = tpu.dynamic_rotate %42 by %c120_i32 dim 1 : vector<1x128xf32>, i32 -> vector<1x128xf32>
    %47 = arith.addf %42, %46 : vector<1x128xf32>
    %c112_i32 = arith.constant 112 : i32
    %48 = tpu.dynamic_rotate %47 by %c112_i32 dim 1 : vector<1x128xf32>, i32 -> vector<1x128xf32>
    %49 = arith.addf %47, %48 : vector<1x128xf32>
    %c96_i32 = arith.constant 96 : i32
    %50 = tpu.dynamic_rotate %49 by %c96_i32 dim 1 : vector<1x128xf32>, i32 -> vector<1x128xf32>
    %51 = arith.addf %49, %50 : vector<1x128xf32>
    %c64_i32 = arith.constant 64 : i32
    %52 = tpu.dynamic_rotate %51 by %c64_i32 dim 1 : vector<1x128xf32>, i32 -> vector<1x128xf32>
    %53 = arith.addf %51, %52 : vector<1x128xf32>
    %cst_14 = arith.constant 0.001953125 : f32
    %54 = vector.broadcast %cst_14 : f32 to vector<1x128xf32>
    %55 = arith.mulf %53, %54 : vector<1x128xf32>
    %c120_i32_15 = arith.constant 120 : i32
    %56 = tpu.dynamic_rotate %45 by %c120_i32_15 dim 1 : vector<1x128xf32>, i32 -> vector<1x128xf32>
    %57 = arith.addf %45, %56 : vector<1x128xf32>
    %c112_i32_16 = arith.constant 112 : i32
    %58 = tpu.dynamic_rotate %57 by %c112_i32_16 dim 1 : vector<1x128xf32>, i32 -> vector<1x128xf32>
    %59 = arith.addf %57, %58 : vector<1x128xf32>
    %c96_i32_17 = arith.constant 96 : i32
    %60 = tpu.dynamic_rotate %59 by %c96_i32_17 dim 1 : vector<1x128xf32>, i32 -> vector<1x128xf32>
    %61 = arith.addf %59, %60 : vector<1x128xf32>
    %c64_i32_18 = arith.constant 64 : i32
    %62 = tpu.dynamic_rotate %61 by %c64_i32_18 dim 1 : vector<1x128xf32>, i32 -> vector<1x128xf32>
    %63 = arith.addf %61, %62 : vector<1x128xf32>
    %cst_19 = arith.constant 0.001953125 : f32
    %64 = vector.broadcast %cst_19 : f32 to vector<1x128xf32>
    %65 = arith.mulf %63, %64 : vector<1x128xf32>
    %66 = arith.mulf %55, %55 : vector<1x128xf32>
    %67 = arith.subf %65, %66 : vector<1x128xf32>
    %68 = vector.broadcast %55 : vector<1x128xf32> to vector<32x128xf32>
    %69 = arith.subf %40, %68 : vector<32x128xf32>
    %c0_20 = arith.constant 0 : index
    %c0_21 = arith.constant 0 : index
    %70 = vector.load %arg4[%c0_20, %c0_21] : memref<1x128xf32, #tpu.memory_space<vmem>>, vector<1x128xf32>
    %cst_22 = arith.constant 9.99999974E-6 : f32
    %71 = vector.broadcast %cst_22 : f32 to vector<1x128xf32>
    %72 = arith.addf %67, %71 : vector<1x128xf32>
    %73 = math.rsqrt %72 : vector<1x128xf32>
    %74 = arith.mulf %70, %73 : vector<1x128xf32>
    %75 = vector.broadcast %74 : vector<1x128xf32> to vector<32x128xf32>
    %76 = arith.mulf %69, %75 : vector<32x128xf32>
    %c0_23 = arith.constant 0 : index
    %c0_24 = arith.constant 0 : index
    %77 = vector.load %arg5[%c0_23, %c0_24] : memref<1x128xf32, #tpu.memory_space<vmem>>, vector<1x128xf32>
    %78 = vector.broadcast %77 : vector<1x128xf32> to vector<32x128xf32>
    %79 = arith.addf %76, %78 : vector<32x128xf32>
    %80 = arith.addf %79, %25 : vector<32x128xf32>
    %c0_25 = arith.constant 0 : index
    %c0_26 = arith.constant 0 : index
    %81 = vector.load %arg6[%c0_25, %c0_26] : memref<1x128xf32, #tpu.memory_space<vmem>>, vector<1x128xf32>
    %c1_i32_27 = arith.constant 1 : i32
    %82 = tpu.dynamic_rotate %80 by %c1_i32_27 dim 0 : vector<32x128xf32>, i32 -> vector<32x128xf32>
    %cst_28 = arith.constant 0.000000e+00 : f32
    %83 = vector.broadcast %cst_28 : f32 to vector<32x128xf32>
    %84 = arith.select %18, %83, %82 : vector<32x128xi1>, vector<32x128xf32>
    %c31_i32_29 = arith.constant 31 : i32
    %85 = tpu.dynamic_rotate %80 by %c31_i32_29 dim 0 : vector<32x128xf32>, i32 -> vector<32x128xf32>
    %cst_30 = arith.constant 0.000000e+00 : f32
    %86 = vector.broadcast %cst_30 : f32 to vector<32x128xf32>
    %87 = arith.select %20, %86, %85 : vector<32x128xi1>, vector<32x128xf32>
    %88 = tpu.concatenate %84, %80, %87 in 1 : vector<32x128xf32>, vector<32x128xf32>, vector<32x128xf32> -> vector<32x384xf32>
    %89 = arith.truncf %88 : vector<32x384xf32> to vector<32x384xbf16>
    %c0_31 = arith.constant 0 : index
    %c0_32 = arith.constant 0 : index
    %90 = vector.load %arg2[%c0_31, %c0_32] : memref<384x128xbf16, #tpu.memory_space<vmem>>, vector<384x128xbf16>
    %cst_33 = arith.constant dense<0.000000e+00> : vector<32x128xf32>
    %91 = tpu.matmul %89, %90, %cst_33 {dimension_numbers = #tpu.dot_dimension_numbers<[1], [0], [0], [1], [0, 0, 1, 1], [], []>} : vector<32x384xbf16>, vector<384x128xbf16>, vector<32x128xf32> -> vector<32x128xf32>
    %92 = vector.broadcast %81 : vector<1x128xf32> to vector<32x128xf32>
    %93 = arith.addf %91, %92 : vector<32x128xf32>
    %c31_i32_34 = arith.constant 31 : i32
    %94 = tpu.dynamic_rotate %93 by %c31_i32_34 dim 0 : vector<32x128xf32>, i32 -> vector<32x128xf32>
    %95 = arith.maximumf %93, %94 : vector<32x128xf32>
    %c120_i32_35 = arith.constant 120 : i32
    %96 = tpu.dynamic_rotate %95 by %c120_i32_35 dim 1 : vector<32x128xf32>, i32 -> vector<32x128xf32>
    %97 = arith.maximumf %95, %96 : vector<32x128xf32>
    %c0_36 = arith.constant 0 : index
    %c0_37 = arith.constant 0 : index
    %98 = vector.load %arg7[%c0_36, %c0_37] : memref<1x128xf32, #tpu.memory_space<vmem>>, vector<1x128xf32>
    %c2_i32_38 = arith.constant 2 : i32
    %99 = tpu.dynamic_rotate %97 by %c2_i32_38 dim 0 : vector<32x128xf32>, i32 -> vector<32x128xf32>
    %cst_39 = arith.constant 0.000000e+00 : f32
    %100 = vector.broadcast %cst_39 : f32 to vector<32x128xf32>
    %101 = arith.select %22, %100, %99 : vector<32x128xi1>, vector<32x128xf32>
    %c30_i32 = arith.constant 30 : i32
    %102 = tpu.dynamic_rotate %97 by %c30_i32 dim 0 : vector<32x128xf32>, i32 -> vector<32x128xf32>
    %cst_40 = arith.constant 0.000000e+00 : f32
    %103 = vector.broadcast %cst_40 : f32 to vector<32x128xf32>
    %104 = arith.select %24, %103, %102 : vector<32x128xi1>, vector<32x128xf32>
    %105 = tpu.concatenate %101, %97, %104 in 1 : vector<32x128xf32>, vector<32x128xf32>, vector<32x128xf32> -> vector<32x384xf32>
    %106 = arith.truncf %105 : vector<32x384xf32> to vector<32x384xbf16>
    %c0_41 = arith.constant 0 : index
    %c0_42 = arith.constant 0 : index
    %107 = vector.load %arg3[%c0_41, %c0_42] : memref<384x128xbf16, #tpu.memory_space<vmem>>, vector<384x128xbf16>
    %cst_43 = arith.constant dense<0.000000e+00> : vector<32x128xf32>
    %108 = tpu.matmul %106, %107, %cst_43 {dimension_numbers = #tpu.dot_dimension_numbers<[1], [0], [0], [1], [0, 0, 1, 1], [], []>} : vector<32x384xbf16>, vector<384x128xbf16>, vector<32x128xf32> -> vector<32x128xf32>
    %109 = vector.broadcast %98 : vector<1x128xf32> to vector<32x128xf32>
    %110 = arith.addf %108, %109 : vector<32x128xf32>
    %c0_44 = arith.constant 0 : index
    %c0_45 = arith.constant 0 : index
    %111 = vector.load %arg8[%c0_44, %c0_45] : memref<32x128xf32, #tpu.memory_space<vmem>>, vector<32x128xf32>
    tpu.vector_store %arg8[%c0_44, %c0_45], %110 {strides = array<i32>} : memref<32x128xf32, #tpu.memory_space<vmem>>, vector<32x128xf32>,
    return
  }
}

</mosaic_0001>

<bundles_post_ra>
// kernel: architecture_forward.1
= control target key start
LH: loop header
LB: loop body
LE: loop exit
PB: predicated region body
PF: predicated region fallthrough
CT: control target
= control target key end

     0   :  { %v30_v8 = vlaneseq  ;;  %vm1601_vm4 = vmmov 1   ;;  %s1604_s17 = smov 96   ;;  %s1605_s30 = smov 64   ;;  %s2086_s1 = inlined_call_operand.vmem [shape: bf16[384,128], index: 1, kind: input, shape index: {}]   ;;  %s2087_s0 = inlined_call_operand.vmem [shape: f32[32,128], index: 0, kind: input, shape index: {}]   ;;  %s2088_s2 = inlined_call_operand.vmem [shape: bf16[384,128], index: 2, kind: input, shape index: {}]   ;;  %s2089_s4 = inlined_call_operand.vmem [shape: f32[1,128], index: 4, kind: input, shape index: {}]   ;;  %s2090_s5 = inlined_call_operand.vmem [shape: f32[1,128], index: 5, kind: input, shape index: {}]   ;;  %s2091_s3 = inlined_call_operand.vmem [shape: bf16[384,128], index: 3, kind: input, shape index: {}]   ;;  %s2092_s6 = inlined_call_operand.vmem [shape: f32[1,128], index: 6, kind: input, shape index: {}]   ;;  %s2093_s7 = inlined_call_operand.vmem [shape: f32[1,128], index: 7, kind: input, shape index: {}]   ;;  %s2094_s8 = inlined_call_operand.vmem [shape: f32[32,128], index: 8, kind: output, shape index: {}]  }
   0x1   :  { %v1527_v0 = vld [vmem:[%s2086_s1 + $0x40] sm:$0xff]   ;;  %v1530_v3 = vld [vmem:[%s2086_s1 + $0x48] sm:$0xff]   ;;  %v1533_v6 = vld [vmem:[%s2086_s1 + $0x50] sm:$0xff]  }
   0x2   :  { %v1528_v1 = vld [vmem:[%s2086_s1] sm:$0xff]   ;;  %1343 = vmatprep.subr.bf16.mxu0 %v1527_v0  ;;  %v1531_v4 = vld [vmem:[%s2086_s1 + $0x8] sm:$0xff]   ;;  %v1534_v7 = vld [vmem:[%s2086_s1 + $0x10] sm:$0xff]   ;;  %v1687_v13 = vshrl.u32 %v30_v8, 7 }
   0x3   :  { %v1529_v2 = vld [vmem:[%s2086_s1 + $0x80] sm:$0xff]   ;;  %1344 = vmatpush3.bf16.msra.mxu0 %v1528_v1  ;;  %v1532_v5 = vld [vmem:[%s2086_s1 + $0x88] sm:$0xff]   ;;  %v1535_v9 = vld [vmem:[%s2086_s1 + $0x90] sm:$0xff]  }
   0x4   :  { %1457 = vmatprep.subr.bf16.mxu1 %v1529_v2  ;;  %1345 = vmatprep.subr.bf16.mxu0 %v1530_v3  ;;  %v1536_v10 = vld [vmem:[%s2086_s1 + $0x58] sm:$0xff]   ;;  %v1539_v14 = vld [vmem:[%s2086_s1 + $0x60] sm:$0xff]   ;;  %v1699_v17 = vadd.s32 8, %v1687_v13  ;;  %v1542_v18 = vld [vmem:[%s2086_s1 + $0x68] sm:$0xff]   ;;  %v1715_v23 = vadd.s32 24, %v1687_v13  ;;  %v39_v26 = vand.u32 15, %v1687_v13 }
   0x5   :  { %1458 = vmatpush3.bf16.msra.mxu1 %v1529_v2  ;;  %v1537_v11 = vld [vmem:[%s2086_s1 + $0x18] sm:$0xff]   ;;  %v1541_v15 = vld [vmem:[%s2086_s1 + $0xa0] sm:$0xff]   ;;  %v1544_v19 = vld [vmem:[%s2086_s1 + $0xa8] sm:$0xff]   ;;  %vm107_vm0 = vcmp.lt.s32.totalorder %v1687_v13, 1  ;;  %vm120_vm1 = vcmp.lt.s32.totalorder %v1687_v13, 7  ;;  %v1789_v49 = vadd.s32 16, %v1687_v13 }
   0x6   :  { %1459 = vmatprep.subr.bf16.mxu1 %v1532_v5  ;;  %v1538_v12 = vld [vmem:[%s2086_s1 + $0x98] sm:$0xff]   ;;  %v1540_v16 = vld [vmem:[%s2086_s1 + $0x20] sm:$0xff]   ;;  %v1543_v20 = vld [vmem:[%s2086_s1 + $0x28] sm:$0xff]   ;;  %v46_v21 = vand.u32 15, %v1699_v17  ;;  %v60_v32 = vand.u32 15, %v1715_v23  ;;  %vm1339_vm3 = vcmp.ne.s32.totalorder %v39_v26, 0 }
   0x7   :  { %1346 = vmatpush3.bf16.msra.mxu0 %v1531_v4  ;;  %v1545_v22 = vld [vmem:[%s2086_s1 + $0x70] sm:$0xff]   ;;  %v1548_v27 = vld [vmem:[%s2086_s1 + $0x78] sm:$0xff]   ;;  %v1731_v28 = vld [vmem:[%s2087_s0] sm:$0xff]  ;;  %v53_v58 = vand.u32 15, %v1789_v49  ;;  %vm1335_vm15 = vcmp.ge.s32.totalorder %v39_v26, 2 }
   0x8   :  { %1347 = vmatprep.subr.bf16.mxu0 %v1533_v6  ;;  %v1546_v24 = vld [vmem:[%s2086_s1 + $0x30] sm:$0xff]   ;;  %v1736_v29 = vld [vmem:[%s2087_s0 + $0x8] sm:$0xff]  ;;  %v1741_v30 = vld [vmem:[%s2087_s0 + $0x18] sm:$0xff]  ;;  %vm1746_vm2 = vcmp.ne.s32.totalorder %v46_v21, 15  ;;  %v103_v33 = vrot.slane %v1731_v28, 7  ;;  %v116_v39 = vrot.slane %v1731_v28, 1 }
   0x9   :  { %1460 = vmatpush3.bf16.msra.mxu1 %v1532_v5  ;;  %v1547_v25 = vld [vmem:[%s2086_s1 + $0xb0] sm:$0xff]   ;;  %v104_v34 = vrot.slane %v1736_v29, 7  ;;  %v130_v35 = vpack.c.bf16 %v1736_v29, %v1731_v28  ;;  %v106_v36 = vrot.slane %v1741_v30, 7  ;;  %v1550_v38 = vld [vmem:[%s2086_s1 + $0xb8] sm:$0xff]   ;;  %v117_v40 = vrot.slane %v1736_v29, 1  ;;  %vm1784_vm5 = vmpackc.low %vm1746_vm2, %vm1601_vm4 }
   0xa   :  { %1461 = vmatprep.subr.bf16.mxu1 %v1535_v9  ;;  %v1759_v37 = vld [vmem:[%s2087_s0 + $0x10] sm:$0xff]  ;;  %v119_v42 = vrot.slane %v1741_v30, 1  ;;  %v1549_v43 = vld [vmem:[%s2086_s1 + $0x38] sm:$0xff]   ;;  %vm1342_vm6 = vcmp.ne.s32.totalorder %v60_v32, 15  ;;  %vm1798_vm7 = vmpackc.low %vm1601_vm4, %vm1339_vm3  ;;  %vm1340_vm9 = vcmp.ne.s32.totalorder %v53_v58, 0  ;;  %s1602_s0 = smov 120  }
   0xb   :  { %1348 = vmatpush3.bf16.msra.mxu0 %v1534_v7  ;;  %v118_v41 = vrot.slane %v1759_v37, 1  ;;  %359 = vmatprep.mubr.bf16.mxu0 %v130_v35  ;;  %v110_v44 = vsel %vm107_vm0, %v103_v33, %v104_v34  ;;  %v111_v45 = vsel %vm107_vm0, %v106_v36, %v103_v33  ;;  %v123_v47 = vsel %vm120_vm1, %v116_v39, %v117_v40  ;;  %vm1809_vm8 = vmpackc.low %vm1342_vm6, %vm1601_vm4  ;;  %s1603_s1 = smov 112   ;;  %v1575_v54 = vld [vmem:[%s2091_s3 + $0x40] sm:$0xff]   ;;  %v1579_v63 = vld [vmem:[%s2091_s3 + $0x8] sm:$0xff]  }
   0xc   :  { %1349 = vmatprep.subr.bf16.mxu0 %v1536_v10  ;;  %v124_v52 = vsel %vm120_vm1, %v119_v42, %v116_v39  ;;  %v1238_v53 = vpack.c.bf16 %v110_v44, %v111_v45  ;;  %v133_v55 = vpack.c.bf16 %v1741_v30, %v1759_v37  ;;  %v105_v56 = vrot.slane %v1759_v37, 7  ;;  %vm1824_vm10 = vmpackc.low %vm1601_vm4, %vm1340_vm9  ;;  %v1576_v48 = vld [vmem:[%s2091_s3] sm:$0xff]  }
   0xd   :  { %1462 = vmatpush3.bf16.msra.mxu1 %v1535_v9  ;;  %v122_v46 = vsel %vm120_vm1, %v117_v40, %v118_v41  ;;  %v121_v51 = vsel %vm120_vm1, %v118_v41, %v119_v42  ;;  %v1577_v59 = vld [vmem:[%s2091_s3 + $0x80] sm:$0xff]   ;;  %vm1320_vm2 = vmpackc.low %vm1601_vm4, %vm1335_vm15  ;;  %vm1337_vm3 = vcmp.lt.s32.totalorder %v46_v21, 14 }
   0xe   :  { %1463 = vmatprep.subr.bf16.mxu1 %v1538_v12  ;;  %v1246_v50 = vpack.c.bf16 %v122_v46, %v123_v47  ;;  %v1250_v57 = vpack.c.bf16 %v124_v52, %v121_v51  ;;  %v108_v60 = vsel %vm107_vm0, %v105_v56, %v106_v36  ;;  %v109_v61 = vsel %vm107_vm0, %v104_v34, %v105_v56  ;;  %vm1328_vm6 = vmpackc.low %vm1337_vm3, %vm1601_vm4 }
   0xf   :  { %1350 = vmatpush3.bf16.msra.mxu0 %v1537_v11  ;;  %v1242_v62 = vpack.c.bf16 %v108_v60, %v109_v61 }
  0x10   :  { %1351 = vmatprep.subr.bf16.mxu0 %v1539_v14  ;;  %1473 = vmatprep.mubr.msk.bf16.mxu1 %vm1784_vm5, %v1246_v50 }
  0x11   :  { %1464 = vmatpush3.bf16.msra.mxu1 %v1538_v12 }
  0x12   :  { %1465 = vmatprep.subr.bf16.mxu1 %v1541_v15 }
  0x13   :  { %1352 = vmatpush3.bf16.msra.mxu0 %v1540_v16 }
  0x14   :  { %1353 = vmatprep.subr.bf16.mxu0 %v1542_v18 }
  0x15   :  { %1466 = vmatpush3.bf16.msra.mxu1 %v1541_v15 }
  0x16   :  { %1467 = vmatprep.subr.bf16.mxu1 %v1544_v19 }
  0x17   :  { %1354 = vmatpush3.bf16.msra.mxu0 %v1543_v20 }
  0x18   :  { %1355 = vmatprep.subr.bf16.mxu0 %v1545_v22 }
  0x19   :  { %1468 = vmatpush3.bf16.msra.mxu1 %v1544_v19 }
  0x1a   :  { %1469 = vmatprep.subr.bf16.mxu1 %v1547_v25 }
  0x1b   :  { %1356 = vmatpush3.bf16.msra.mxu0 %v1546_v24 }
  0x1c   :  { %1357 = vmatprep.subr.bf16.mxu0 %v1548_v27 }
  0x1d   :  { %1470 = vmatpush3.bf16.msra.mxu1 %v1547_v25 }
  0x1e   :  { %1471 = vmatprep.subr.bf16.mxu1 %v1550_v38 }
  0x1f   :  { %1358 = vmatpush3.bf16.msra.mxu0 %v1549_v43 }
  0x21   :  { %1472 = vmatpush3.bf16.msra.mxu1 %v1550_v38 }
  0x22   :  { %1239 = vmatmul.mubr.msk.bf16.vlgmr.msra.gmra.mrb[0].mxu0 %vm1798_vm7, %v1238_v53 }
  0x23   :  { %367 = vmatprep.mubr.bf16.mxu0 %v133_v55 }
  0x24   :  { %1474 = vmatmul.mubr.msk.bf16.vlgmr.msra.gmra.mrb[0].mxu1 %vm1809_vm8, %v1250_v57 }
  0x2a   :  { %1243 = vmatmul.mubr.msk.bf16.gmra.mrb[4].mxu0 %vm1824_vm10, %v1242_v62 }
  0xf5   :  { %v1359_v0 = vpop.f32.mrb[0].mxu0 }
  0xf6   :  { %v1360_v1 = vpop.f32.mrb[1].mxu0 }
  0xf7   :  { %v1361_v2 = vadd.f32 %v1360_v1, %v1359_v0  ;;  %v1362_v3 = vpop.f32.mrb[2].mxu0  ;;  %v1475_v4 = vpop.f32.mrb[0].mxu1 }
  0xf8   :  { %v1363_v5 = vpop.f32.mrb[3].mxu0  ;;  %v410_v6 = vpop.f32.mrb[1].mxu1 }
  0xf9   :  { %v1364_v7 = vadd.f32 %v1363_v5, %v1362_v3  ;;  %v411_v8 = vadd.f32 %v1361_v2, %v410_v6  ;;  %v1476_v9 = vpop.f32.mrb[2].mxu1 }
  0xfa   :  { %v413_v10 = vpop.f32.mrb[3].mxu1 }
  0xfb   :  { %v414_v11 = vadd.f32 %v1364_v7, %v413_v10  ;;  %v429_v12 = vmul.f32 0.1, %v411_v8  ;;  %vm425_vm12 = vcmp.gt.f32.partialorder %v411_v8, 0.0  ;;  %v1551_v10 = vld [vmem:[%s2088_s2 + $0x40] sm:$0xff]  }
  0xfc   :  { %1381 = vmatprep.subr.bf16.mxu0 %v1551_v10 }
  0xfd   :  { %vm426_vm11 = vcmp.gt.f32.partialorder %v414_v11, 0.0  ;;  %v430_v14 = vmul.f32 0.1, %v414_v11  ;;  %v1365_v15 = vpop.f32.mrb[4].mxu0  ;;  %v1832_v24 = vsel %vm425_vm12, %v411_v8, %v429_v12  ;;  %v1553_v12 = vld [vmem:[%s2088_s2 + $0x80] sm:$0xff]  }
  0xfe   :  { %v1366_v16 = vpop.f32.mrb[5].mxu0  ;;  %v446_v35 = vmul.f32 %v1832_v24, %v1832_v24  ;;  %1477 = vmatprep.subr.bf16.mxu1 %v1553_v12 }
  0xff   :  { %v1830_v18 = vsel %vm426_vm11, %v414_v11, %v430_v14  ;;  %v1367_v19 = vadd.f32 %v1366_v16, %v1365_v15  ;;  %v1368_v20 = vpop.f32.mrb[6].mxu0  ;;  %v1552_v11 = vld [vmem:[%s2088_s2] sm:$0xff]   ;;  %v1554_v14 = vld [vmem:[%s2088_s2 + $0x48] sm:$0xff]   ;;  %1478 = vmatpush3.bf16.msra.mxu1 %v1553_v12 }
 0x100   :  { %v1369_v22 = vpop.f32.mrb[7].mxu0  ;;  %v447_v31 = vmul.f32 %v1830_v18, %v1830_v18  ;;  %v437_v36 = vadd.f32 %v1830_v18, %v1832_v24  ;;  %1382 = vmatpush3.bf16.msra.mxu0 %v1552_v11  ;;  %v1555_v16 = vld [vmem:[%s2088_s2 + $0x8] sm:$0xff]  }
 0x101   :  { %v419_v25 = vadd.f32 %v1475_v4, %v1367_v19  ;;  %v1370_v27 = vadd.f32 %v1369_v22, %v1368_v20  ;;  %1383 = vmatprep.subr.bf16.mxu0 %v1554_v14  ;;  %v1556_v20 = vld [vmem:[%s2088_s2 + $0x88] sm:$0xff]   ;;  %v1557_v22 = vld [vmem:[%s2088_s2 + $0x50] sm:$0xff]   ;;  %v1252_v14 = vld [vmem:[%s2090_s5] ss:$0 sm:$0xff] }
 0x102   :  { %v450_v40 = vadd.f32 %v447_v31, %v446_v35  ;;  %1479 = vmatprep.subr.bf16.mxu1 %v1556_v20  ;;  %v1559_v31 = vld [vmem:[%s2088_s2 + $0x90] sm:$0xff]   ;;  %v1561_v35 = vld [vmem:[%s2088_s2 + $0x18] sm:$0xff]  }
 0x103   :  { %vm427_vm13 = vcmp.gt.f32.partialorder %v419_v25, 0.0  ;;  %v431_v33 = vmul.f32 0.1, %v419_v25  ;;  %v422_v34 = vadd.f32 %v1476_v9, %v1370_v27  ;;  %v1558_v27 = vld [vmem:[%s2088_s2 + $0x10] sm:$0xff]   ;;  %1480 = vmatpush3.bf16.msra.mxu1 %v1556_v20 }
 0x104   :  { %1384 = vmatpush3.bf16.msra.mxu0 %v1555_v16  ;;  %1481 = vmatprep.subr.bf16.mxu1 %v1559_v31 }
 0x105   :  { %v1840_v38 = vsel %vm427_vm13, %v419_v25, %v431_v33  ;;  %vm428_vm14 = vcmp.gt.f32.partialorder %v422_v34, 0.0  ;;  %v432_v39 = vmul.f32 0.1, %v422_v34  ;;  %1385 = vmatprep.subr.bf16.mxu0 %v1557_v22 }
 0x106   :  { %v438_v41 = vadd.f32 %v437_v36, %v1840_v38  ;;  %v448_v42 = vmul.f32 %v1840_v38, %v1840_v38  ;;  %v1562_v36 = vld [vmem:[%s2088_s2 + $0x98] sm:$0xff]  }
 0x107   :  { %v1845_v43 = vsel %vm428_vm14, %v422_v34, %v432_v39  ;;  %v1560_v34 = vld [vmem:[%s2088_s2 + $0x58] sm:$0xff]   ;;  %1482 = vmatpush3.bf16.msra.mxu1 %v1559_v31  ;;  %v1563_v39 = vld [vmem:[%s2088_s2 + $0x60] sm:$0xff]  }
 0x108   :  { %v451_v44 = vadd.f32 %v450_v40, %v448_v42  ;;  %v449_v45 = vmul.f32 %v1845_v43, %v1845_v43  ;;  %v439_v46 = vadd.f32 %v438_v41, %v1845_v43  ;;  %1386 = vmatpush3.bf16.msra.mxu0 %v1558_v27  ;;  %1483 = vmatprep.subr.bf16.mxu1 %v1562_v36  ;;  %v1564_v40 = vld [vmem:[%s2088_s2 + $0x20] sm:$0xff]   ;;  %v1566_v42 = vld [vmem:[%s2088_s2 + $0x68] sm:$0xff]  }
 0x109   :  { %1387 = vmatprep.subr.bf16.mxu0 %v1560_v34  ;;  %v1565_v41 = vld [vmem:[%s2088_s2 + $0xa0] sm:$0xff]  }
 0x10a   :  { %v440_v47 = vrot.slane %v439_v46, 4  ;;  %v452_v50 = vadd.f32 %v451_v44, %v449_v45  ;;  %v1567_v44 = vld [vmem:[%s2088_s2 + $0x28] sm:$0xff]  }
 0x10b   :  { %1484 = vmatpush3.bf16.msra.mxu1 %v1562_v36  ;;  %v1568_v45 = vld [vmem:[%s2088_s2 + $0xa8] sm:$0xff]  }
 0x10c   :  { %v441_v51 = vadd.f32 %v440_v47, %v439_v46  ;;  %v453_v52 = vrot.slane %v452_v50, 4  ;;  %1388 = vmatpush3.bf16.msra.mxu0 %v1561_v35  ;;  %1485 = vmatprep.subr.bf16.mxu1 %v1565_v41  ;;  %v1569_v46 = vld [vmem:[%s2088_s2 + $0x70] sm:$0xff]  }
 0x10d   :  { %1389 = vmatprep.subr.bf16.mxu0 %v1563_v39  ;;  %v1570_v47 = vld [vmem:[%s2088_s2 + $0x30] sm:$0xff]  }
 0x10e   :  { %v442_v53 = vrot.slane %v441_v51, 2  ;;  %v454_v55 = vadd.f32 %v453_v52, %v452_v50  ;;  %v1571_v50 = vld [vmem:[%s2088_s2 + $0xb0] sm:$0xff]   ;;  %v1573_v52 = vld [vmem:[%s2088_s2 + $0x38] sm:$0xff]  }
 0x10f   :  { %1486 = vmatpush3.bf16.msra.mxu1 %v1565_v41 }
 0x110   :  { %v443_v56 = vadd.f32 %v442_v53, %v441_v51  ;;  %v455_v57 = vrot.slane %v454_v55, 2  ;;  %1390 = vmatpush3.bf16.msra.mxu0 %v1564_v40  ;;  %1487 = vmatprep.subr.bf16.mxu1 %v1568_v45  ;;  %v1572_v51 = vld [vmem:[%s2088_s2 + $0x78] sm:$0xff]  }
 0x111   :  { %1391 = vmatprep.subr.bf16.mxu0 %v1566_v42  ;;  %v1574_v53 = vld [vmem:[%s2088_s2 + $0xb8] sm:$0xff]  }
 0x112   :  { %v444_v60 = vrot.slane %v443_v56, 1  ;;  %v456_v61 = vadd.f32 %v455_v57, %v454_v55 }
 0x113   :  { %1488 = vmatpush3.bf16.msra.mxu1 %v1568_v45 }
 0x114   :  { %v445_v62 = vadd.f32 %v444_v60, %v443_v56  ;;  %v457_v0 = vrot.slane %v456_v61, 1  ;;  %1392 = vmatpush3.bf16.msra.mxu0 %v1567_v44  ;;  %1489 = vmatprep.subr.bf16.mxu1 %v1571_v50 }
 0x115   :  { %1393 = vmatprep.subr.bf16.mxu0 %v1569_v46 }
 0x116   :  { %459 = vrot.lane.b32.xlu0 %v445_v62, %s1602_s0  ;;  %v458_v1 = vadd.f32 %v457_v0, %v456_v61 }
 0x117   :  { %1490 = vmatpush3.bf16.msra.mxu1 %v1571_v50 }
 0x118   :  { %1394 = vmatpush3.bf16.msra.mxu0 %v1570_v47  ;;  %1491 = vmatprep.subr.bf16.mxu1 %v1574_v53 }
 0x119   :  { %1395 = vmatprep.subr.bf16.mxu0 %v1572_v51 }
 0x11a   :  { %472 = vrot.lane.b32.xlu0 %v458_v1, %s1602_s0 }
 0x11b   :  { %1492 = vmatpush3.bf16.msra.mxu1 %v1574_v53 }
 0x11c   :  { %1396 = vmatpush3.bf16.msra.mxu0 %v1573_v52  ;;  %1497 = vmatprep.subr.bf16.mxu1 %v1577_v59 }
 0x11d   :  { %1419 = vmatprep.subr.bf16.mxu0 %v1575_v54  ;;  %v1598_v54 = vld [vmem:[%s2091_s3 + $0xb8] sm:$0xff]  }
 0x188   :  { %v460_v2 = vpop.permute.xlu0 %459 }
 0x189   :  { %v461_v3 = vadd.f32 %v460_v2, %v445_v62 }
 0x18b   :  { %462 = vrot.lane.b32.xlu1 %v461_v3, %s1603_s1 }
 0x18c   :  { %v473_v4 = vpop.permute.xlu0 %472 }
 0x18d   :  { %v474_v5 = vadd.f32 %v473_v4, %v458_v1 }
 0x18f   :  { %475 = vrot.lane.b32.xlu1 %v474_v5, %s1603_s1 }
 0x1fd   :  { %v463_v6 = vpop.permute.xlu1 %462 }
 0x1fe   :  { %v464_v7 = vadd.f32 %v463_v6, %v461_v3  ;;  %v489_v3 = vsub.s32 0, %v1687_v13 }
 0x200   :  { %465 = vrot.lane.b32.xlu0 %v464_v7, %s1604_s17 }
 0x201   :  { %v476_v8 = vpop.permute.xlu1 %475 }
 0x202   :  { %v477_v9 = vadd.f32 %v476_v8, %v474_v5  ;;  %v495_v5 = vld [vmem:[%s2089_s4] sm:$0x1] }
 0x204   :  { %478 = vrot.lane.b32.xlu1 %v477_v9, %s1604_s17 }
 0x272   :  { %v466_v15 = vpop.permute.xlu0 %465 }
 0x273   :  { %v467_v19 = vadd.f32 %v466_v15, %v464_v7 }
 0x275   :  { %468 = vrot.lane.b32.xlu0 %v467_v19, %s1605_s30 }
 0x276   :  { %v479_v25 = vpop.permute.xlu1 %478 }
 0x277   :  { %v480_v33 = vadd.f32 %v479_v25, %v477_v9 }
 0x279   :  { %481 = vrot.lane.b32.xlu1 %v480_v33, %s1605_s30 }
 0x2e7   :  { %v469_v55 = vpop.permute.xlu0 %468 }
 0x2e8   :  { %v470_v56 = vadd.f32 %v469_v55, %v467_v19 }
 0x2ea   :  { %v471_v57 = vmul.f32 0.001953125, %v470_v56 }
 0x2eb   :  { %v482_v60 = vpop.permute.xlu1 %481 }
 0x2ec   :  { %v483_v61 = vadd.f32 %v482_v60, %v480_v33  ;;  %v485_v62 = vmul.f32 %v471_v57, %v471_v57  ;;  %v490_v4 = vrot.slane %v471_v57, %v489_v3  ;;  %v1578_v57 = vld [vmem:[%s2091_s3 + $0x48] sm:$0xff]  }
 0x2ed   :  { %v1580_v60 = vld [vmem:[%s2091_s3 + $0x88] sm:$0xff]  }
 0x2ee   :  { %v484_v0 = vmul.f32 0.001953125, %v483_v61  ;;  %v491_v8 = vsub.f32 %v1832_v24, %v490_v4  ;;  %v492_v9 = vsub.f32 %v1830_v18, %v490_v4  ;;  %v493_v10 = vsub.f32 %v1840_v38, %v490_v4  ;;  %v1581_v61 = vld [vmem:[%s2091_s3 + $0x50] sm:$0xff]  }
 0x2ef   :  { %v494_v11 = vsub.f32 %v1845_v43, %v490_v4  ;;  %v1587_v4 = vld [vmem:[%s2091_s3 + $0x60] sm:$0xff]  }
 0x2f0   :  { %v486_v1 = vsub.f32 %v484_v0, %v485_v62  ;;  %v1582_v62 = vld [vmem:[%s2091_s3 + $0x10] sm:$0xff]  }
 0x2f1   :  { %v1583_v0 = vld [vmem:[%s2091_s3 + $0x90] sm:$0xff]  }
 0x2f2   :  { %v496_v2 = vadd.f32 1e-05, %v486_v1  ;;  %v1584_v1 = vld [vmem:[%s2091_s3 + $0x58] sm:$0xff]  }
 0x2f4   :  { %1599 = vrsqrt.f32 %v496_v2  ;;  %v1585_v2 = vld [vmem:[%s2091_s3 + $0x18] sm:$0xff]  }
 0x2fe   :  { %v1600_v6 = vpop.eup %1599 }
 0x2ff   :  { %v498_v7 = vmul.f32 %v1600_v6, %v495_v5  ;;  %v1589_v5 = vld [vmem:[%s2091_s3 + $0xa0] sm:$0xff]  }
 0x300   :  { %v1588_v6 = vld [vmem:[%s2091_s3 + $0x20] sm:$0xff]  }
 0x301   :  { %v503_v12 = vrot.slane %v498_v7, %v489_v3  ;;  %v1586_v3 = vld [vmem:[%s2091_s3 + $0x98] sm:$0xff]   ;;  %v1590_v7 = vld [vmem:[%s2091_s3 + $0x68] sm:$0xff]  }
 0x303   :  { %v505_v15 = vmul.f32 %v503_v12, %v491_v8  ;;  %v506_v16 = vmul.f32 %v503_v12, %v492_v9  ;;  %v507_v19 = vmul.f32 %v503_v12, %v493_v10  ;;  %v508_v20 = vmul.f32 %v503_v12, %v494_v11  ;;  %v1591_v8 = vld [vmem:[%s2091_s3 + $0x28] sm:$0xff]   ;;  %v1253_v11 = vld [vmem:[%s2092_s6] ss:$0 sm:$0xff] }
 0x305   :  { %v516_v22 = vadd.f32 %v1252_v14, %v505_v15  ;;  %v517_v25 = vadd.f32 %v1252_v14, %v506_v16  ;;  %v518_v27 = vadd.f32 %v1252_v14, %v507_v19  ;;  %v519_v31 = vadd.f32 %v1252_v14, %v508_v20 }
 0x307   :  { %v520_v24 = vadd.f32 %v516_v22, %v1731_v28  ;;  %v521_v18 = vadd.f32 %v517_v25, %v1736_v29  ;;  %v523_v38 = vadd.f32 %v519_v31, %v1741_v30  ;;  %v522_v43 = vadd.f32 %v518_v27, %v1759_v37 }
 0x309   :  { %v525_v33 = vrot.slane %v520_v24, 7  ;;  %v526_v34 = vrot.slane %v521_v18, 7  ;;  %v528_v35 = vrot.slane %v523_v38, 7  ;;  %v550_v36 = vpack.c.bf16 %v521_v18, %v520_v24 }
 0x30a   :  { %v537_v39 = vrot.slane %v520_v24, 1  ;;  %v538_v40 = vrot.slane %v521_v18, 1  ;;  %v539_v41 = vrot.slane %v522_v43, 1  ;;  %v540_v28 = vrot.slane %v523_v38, 1 }
 0x30b   :  { %v531_v42 = vsel %vm107_vm0, %v525_v33, %v526_v34  ;;  %v532_v44 = vsel %vm107_vm0, %v528_v35, %v525_v33  ;;  %785 = vmatprep.mubr.bf16.mxu0 %v550_v36  ;;  %v553_v45 = vpack.c.bf16 %v523_v38, %v522_v43  ;;  %v527_v51 = vrot.slane %v522_v43, 7 }
 0x30c   :  { %v1280_v29 = vpack.c.bf16 %v531_v42, %v532_v44  ;;  %v542_v30 = vsel %vm120_vm1, %v538_v40, %v539_v41  ;;  %v543_v37 = vsel %vm120_vm1, %v537_v39, %v538_v40  ;;  %v541_v47 = vsel %vm120_vm1, %v539_v41, %v540_v28  ;;  %v1592_v40 = vld [vmem:[%s2091_s3 + $0xa8] sm:$0xff]  }
 0x30d   :  { %v1288_v46 = vpack.c.bf16 %v542_v30, %v543_v37  ;;  %v544_v50 = vsel %vm120_vm1, %v540_v28, %v537_v39  ;;  %v529_v53 = vsel %vm107_vm0, %v527_v51, %v528_v35  ;;  %v530_v55 = vsel %vm107_vm0, %v526_v34, %v527_v51  ;;  %v1593_v28 = vld [vmem:[%s2091_s3 + $0x70] sm:$0xff]   ;;  %v1596_v51 = vld [vmem:[%s2091_s3 + $0x78] sm:$0xff]  }
 0x30e   :  { %1281 = vmatmul.mubr.msk.bf16.vlgmr.msra.gmra.mrb[8].mxu0 %vm1798_vm7, %v1280_v29  ;;  %v1292_v52 = vpack.c.bf16 %v544_v50, %v541_v47  ;;  %v1284_v56 = vpack.c.bf16 %v529_v53, %v530_v55  ;;  %v1594_v30 = vld [vmem:[%s2091_s3 + $0x30] sm:$0xff]   ;;  %vm880_vm0 = vcmp.lt.s32.totalorder %v1687_v13, 2 }
 0x30f   :  { %1493 = vmatprep.mubr.msk.bf16.mxu1 %vm1784_vm5, %v1288_v46  ;;  %793 = vmatprep.mubr.bf16.mxu0 %v553_v45  ;;  %v1595_v46 = vld [vmem:[%s2091_s3 + $0xb0] sm:$0xff]   ;;  %vm1338_vm5 = vcmp.lt.s32.totalorder %v60_v32, 14 }
 0x310   :  { %1494 = vmatmul.mubr.msk.bf16.vlgmr.msra.gmra.mrb[4].mxu1 %vm1809_vm8, %v1292_v52  ;;  %1420 = vmatpush3.bf16.msra.mxu0 %v1576_v48  ;;  %v1597_v52 = vld [vmem:[%s2091_s3 + $0x38] sm:$0xff]   ;;  %vm1332_vm7 = vmpackc.low %vm1338_vm5, %vm1601_vm4  ;;  %vm1336_vm8 = vcmp.ge.s32.totalorder %v53_v58, 2 }
 0x311   :  { %1421 = vmatprep.subr.bf16.mxu0 %v1578_v57  ;;  %1498 = vmatpush3.bf16.msra.mxu1 %v1577_v59  ;;  %vm1324_vm9 = vmpackc.low %vm1601_vm4, %vm1336_vm8 }
 0x312   :  { %1499 = vmatprep.subr.bf16.mxu1 %v1580_v60 }
 0x314   :  { %1422 = vmatpush3.bf16.msra.mxu0 %v1579_v63 }
 0x315   :  { %1423 = vmatprep.subr.bf16.mxu0 %v1581_v61  ;;  %1500 = vmatpush3.bf16.msra.mxu1 %v1580_v60 }
 0x316   :  { %1285 = vmatmul.mubr.msk.bf16.gmra.mrb[12].mxu0 %vm1824_vm10, %v1284_v56  ;;  %1501 = vmatprep.subr.bf16.mxu1 %v1583_v0 }
 0x318   :  { %1424 = vmatpush3.bf16.msra.mxu0 %v1582_v62 }
 0x319   :  { %1425 = vmatprep.subr.bf16.mxu0 %v1584_v1  ;;  %1502 = vmatpush3.bf16.msra.mxu1 %v1583_v0 }
 0x31a   :  { %1503 = vmatprep.subr.bf16.mxu1 %v1586_v3 }
 0x31c   :  { %1426 = vmatpush3.bf16.msra.mxu0 %v1585_v2 }
 0x31d   :  { %1427 = vmatprep.subr.bf16.mxu0 %v1587_v4  ;;  %1504 = vmatpush3.bf16.msra.mxu1 %v1586_v3 }
 0x31e   :  { %1505 = vmatprep.subr.bf16.mxu1 %v1589_v5 }
 0x320   :  { %1428 = vmatpush3.bf16.msra.mxu0 %v1588_v6 }
 0x321   :  { %1429 = vmatprep.subr.bf16.mxu0 %v1590_v7  ;;  %1506 = vmatpush3.bf16.msra.mxu1 %v1589_v5 }
 0x322   :  { %1507 = vmatprep.subr.bf16.mxu1 %v1592_v40 }
 0x324   :  { %1430 = vmatpush3.bf16.msra.mxu0 %v1591_v8 }
 0x325   :  { %1431 = vmatprep.subr.bf16.mxu0 %v1593_v28  ;;  %1508 = vmatpush3.bf16.msra.mxu1 %v1592_v40 }
 0x326   :  { %1509 = vmatprep.subr.bf16.mxu1 %v1595_v46 }
 0x328   :  { %1432 = vmatpush3.bf16.msra.mxu0 %v1594_v30 }
 0x329   :  { %1433 = vmatprep.subr.bf16.mxu0 %v1596_v51  ;;  %1510 = vmatpush3.bf16.msra.mxu1 %v1595_v46 }
 0x32a   :  { %1511 = vmatprep.subr.bf16.mxu1 %v1598_v54 }
 0x32c   :  { %1434 = vmatpush3.bf16.msra.mxu0 %v1597_v52 }
 0x32d   :  { %1512 = vmatpush3.bf16.msra.mxu1 %v1598_v54 }
 0x3e1   :  { %v1397_v9 = vpop.f32.mrb[8].mxu0 }
 0x3e2   :  { %v1398_v10 = vpop.f32.mrb[9].mxu0 }
 0x3e3   :  { %v1399_v12 = vadd.f32 %v1398_v10, %v1397_v9  ;;  %v1495_v14 = vpop.f32.mrb[4].mxu1  ;;  %v1400_v15 = vpop.f32.mrb[10].mxu0 }
 0x3e4   :  { %v836_v16 = vpop.f32.mrb[5].mxu1  ;;  %v1401_v19 = vpop.f32.mrb[11].mxu0 }
 0x3e5   :  { %v788_v20 = vadd.f32 %v1399_v12, %v1253_v11  ;;  %v1402_v22 = vadd.f32 %v1401_v19, %v1400_v15  ;;  %v1496_v25 = vpop.f32.mrb[6].mxu1 }
 0x3e6   :  { %v839_v27 = vpop.f32.mrb[7].mxu1 }
 0x3e7   :  { %v837_v31 = vadd.f32 %v836_v16, %v788_v20  ;;  %v791_v24 = vadd.f32 %v1402_v22, %v1253_v11 }
 0x3e9   :  { %v840_v18 = vadd.f32 %v839_v27, %v791_v24  ;;  %v1403_v38 = vpop.f32.mrb[12].mxu0  ;;  %v851_v33 = vrot.slane %v837_v31, 1 }
 0x3ea   :  { %v1404_v43 = vpop.f32.mrb[13].mxu0 }
 0x3eb   :  { %v852_v34 = vrot.slane %v840_v18, 1  ;;  %v1405_v35 = vadd.f32 %v1404_v43, %v1403_v38  ;;  %v1406_v36 = vpop.f32.mrb[14].mxu0 }
 0x3ec   :  { %v1407_v39 = vpop.f32.mrb[15].mxu0 }
 0x3ed   :  { %v796_v41 = vadd.f32 %v1405_v35, %v1253_v11  ;;  %v1408_v42 = vadd.f32 %v1407_v39, %v1406_v36  ;;  %v857_v44 = vsel %vm120_vm1, %v851_v33, %v852_v34 }
 0x3ee   :  { %v859_v29 = vmax.f32 %v837_v31, %v857_v44 }
 0x3ef   :  { %v845_v37 = vadd.f32 %v1495_v14, %v796_v41  ;;  %v799_v45 = vadd.f32 %v1408_v42, %v1253_v11 }
 0x3f1   :  { %v853_v47 = vrot.slane %v845_v37, 1  ;;  %v848_v50 = vadd.f32 %v1496_v25, %v799_v45 }
 0x3f3   :  { %v854_v53 = vrot.slane %v848_v50, 1  ;;  %v856_v55 = vsel %vm120_vm1, %v852_v34, %v853_v47 }
 0x3f4   :  { %v860_v56 = vmax.f32 %v840_v18, %v856_v55 }
 0x3f5   :  { %v858_v48 = vsel %vm120_vm1, %v854_v53, %v851_v33  ;;  %v855_v59 = vsel %vm120_vm1, %v853_v47, %v854_v53  ;;  %vm893_vm1 = vcmp.lt.s32.totalorder %v1687_v13, 6  ;;  %v1294_v33 = vld [vmem:[%s2093_s7] ss:$0 sm:$0xff] }
 0x3f6   :  { %v862_v57 = vmax.f32 %v848_v50, %v858_v48  ;;  %v1522_v63 = vpack.i.bf16 %v860_v56, %v859_v29  ;;  %v861_v60 = vmax.f32 %v845_v37, %v855_v59 }
 0x3f8   :  { %869 = vrot.lane.b32.xlu1 %v862_v57, %s1602_s0  ;;  %1523 = vrot.lane.b32.xlu0 %v1522_v63, %s1602_s0 }
 0x3fc   :  { %867 = vrot.lane.b32.xlu0 %v861_v60, %s1602_s0 }
 0x46a   :  { %v870_v61 = vpop.permute.xlu1 %869  ;;  %v1524_v62 = vpop.permute.xlu0 %1523 }
 0x46b   :  { %v874_v0 = vmax.f32 %v862_v57, %v870_v61  ;;  %v1526_v1 = vunpack.i.h.bf16 %v1524_v62  ;;  %v1525_v2 = vunpack.i.l.bf16 %v1524_v62 }
 0x46d   :  { %v872_v3 = vmax.f32 %v860_v56, %v1526_v1  ;;  %v871_v4 = vmax.f32 %v859_v29, %v1525_v2  ;;  %v879_v6 = vrot.slane %v874_v0, 6  ;;  %v892_v26 = vrot.slane %v874_v0, 2 }
 0x46e   :  { %v868_v5 = vpop.permute.xlu0 %867 }
 0x46f   :  { %v877_v7 = vrot.slane %v872_v3, 6  ;;  %v876_v8 = vrot.slane %v871_v4, 6  ;;  %v890_v9 = vrot.slane %v872_v3, 2  ;;  %v889_v10 = vrot.slane %v871_v4, 2 }
 0x470   :  { %v873_v11 = vmax.f32 %v861_v60, %v868_v5  ;;  %v903_v12 = vpack.c.bf16 %v872_v3, %v871_v4 }
 0x471   :  { %v883_v14 = vsel %vm880_vm0, %v876_v8, %v877_v7  ;;  %v884_v15 = vsel %vm880_vm0, %v879_v6, %v876_v8  ;;  %v897_v27 = vsel %vm893_vm1, %v892_v26, %v889_v10  ;;  %v896_v24 = vsel %vm893_vm1, %v889_v10, %v890_v9 }
 0x472   :  { %v1321_v16 = vpack.c.bf16 %v883_v14, %v884_v15  ;;  %v891_v19 = vrot.slane %v873_v11, 2  ;;  %1138 = vmatprep.mubr.bf16.mxu0 %v903_v12  ;;  %v878_v20 = vrot.slane %v873_v11, 6  ;;  %v906_v22 = vpack.c.bf16 %v874_v0, %v873_v11 }
 0x474   :  { %v894_v25 = vsel %vm893_vm1, %v891_v19, %v892_v26  ;;  %1322 = vmatmul.mubr.msk.bf16.vlgmr.msra.gmra.mrb[16].mxu0 %vm1320_vm2, %v1321_v16  ;;  %v895_v31 = vsel %vm893_vm1, %v890_v9, %v891_v19  ;;  %v881_v21 = vsel %vm880_vm0, %v878_v20, %v879_v6  ;;  %v882_v23 = vsel %vm880_vm0, %v877_v7, %v878_v20 }
 0x475   :  { %v1333_v18 = vpack.c.bf16 %v897_v27, %v894_v25  ;;  %1146 = vmatprep.mubr.bf16.mxu0 %v906_v22  ;;  %v1329_v17 = vpack.c.bf16 %v895_v31, %v896_v24  ;;  %v1325_v32 = vpack.c.bf16 %v881_v21, %v882_v23 }
 0x477   :  { %1513 = vmatprep.mubr.msk.bf16.mxu1 %vm1328_vm6, %v1329_v17 }
 0x478   :  { %1514 = vmatmul.mubr.msk.bf16.vlgmr.msra.gmra.mrb[8].mxu1 %vm1332_vm7, %v1333_v18 }
 0x47c   :  { %1326 = vmatmul.mubr.msk.bf16.gmra.mrb[20].mxu0 %vm1324_vm9, %v1325_v32 }
 0x547   :  { %v1435_v38 = vpop.f32.mrb[16].mxu0 }
 0x548   :  { %v1436_v43 = vpop.f32.mrb[17].mxu0 }
 0x549   :  { %v1437_v49 = vadd.f32 %v1436_v43, %v1435_v38  ;;  %v1438_v58 = vpop.f32.mrb[18].mxu0 }
 0x54a   :  { %v1439_v34 = vpop.f32.mrb[19].mxu0 }
 0x54b   :  { %v1440_v35 = vadd.f32 %v1439_v34, %v1438_v58  ;;  %v1515_v36 = vpop.f32.mrb[8].mxu1  ;;  %v1141_v39 = vadd.f32 %v1437_v49, %v1294_v33 }
 0x54c   :  { %v1189_v40 = vpop.f32.mrb[9].mxu1 }
 0x54d   :  { %v1190_v13 = vadd.f32 %v1189_v40, %v1141_v39  ;;  %v1516_v41 = vpop.f32.mrb[10].mxu1  ;;  %v1144_v42 = vadd.f32 %v1440_v35, %v1294_v33 }
 0x54e   :  { %v1192_v44 = vpop.f32.mrb[11].mxu1 }
 0x54f   :  { %1204 = vst [vmem:[%s2094_s8] sm:$0xff] %v1190_v13  ;;  %v1193_v28 = vadd.f32 %v1192_v44, %v1144_v42  ;;  %v1441_v29 = vpop.f32.mrb[20].mxu0 }
 0x550   :  { %v1442_v30 = vpop.f32.mrb[21].mxu0 }
 0x551   :  { %1205 = vst [vmem:[%s2094_s8 + $0x8] sm:$0xff] %v1193_v28  ;;  %v1443_v37 = vadd.f32 %v1442_v30, %v1441_v29  ;;  %v1444_v45 = vpop.f32.mrb[22].mxu0 }
 0x552   :  { %v1445_v46 = vpop.f32.mrb[23].mxu0 }
 0x553   :  { %v1149_v47 = vadd.f32 %v1443_v37, %v1294_v33  ;;  %v1446_v50 = vadd.f32 %v1445_v46, %v1444_v45 }
 0x555   :  { %v1198_v51 = vadd.f32 %v1515_v36, %v1149_v47  ;;  %v1152_v52 = vadd.f32 %v1446_v50, %v1294_v33 }
 0x557   :  { %1206 = vst [vmem:[%s2094_s8 + $0x10] sm:$0xff] %v1198_v51  ;;  %v1201_v53 = vadd.f32 %v1516_v41, %v1152_v52 }
 0x559   :  { %1207 = vst [vmem:[%s2094_s8 + $0x18] sm:$0xff] %v1201_v53 }

</bundles_post_ra>
